<compile_context>
chip_gen: v7x
topology: tpu7x:2x2x1
jax: 0.10.0
libtpu: 0.0.40
codegen_flags: <defaults>
</compile_context>

<pallas_src>
import jax
import jax.numpy as jnp
import numpy as np
from jax.experimental import pallas as pl
from jax.experimental.pallas import tpu as pltpu


def _round_up(x, m):
    return ((x + m - 1) // m) * m


def actor_kernel(x_ref, w1_ref, b1_ref, w2_ref, b2_ref, w3_ref, b3_ref, o_ref):
    # Cast the f32 state tile to bf16 in-kernel (avoids a separate XLA pass over x).
    x = x_ref[...].astype(w1_ref.dtype)
    # fc1 + ReLU  (bf16 MXU matmul, f32 accumulate; bias/activation in f32)
    h1 = jnp.dot(x, w1_ref[...], preferred_element_type=jnp.float32)
    h1 = jnp.maximum(h1 + b1_ref[...], 0.0)
    # fc2 + ReLU
    h2 = jnp.dot(h1.astype(w2_ref.dtype), w2_ref[...],
                 preferred_element_type=jnp.float32)
    h2 = jnp.maximum(h2 + b2_ref[...], 0.0)
    # fc3 + tanh (kept in f32)
    h3 = jnp.dot(h2.astype(w3_ref.dtype), w3_ref[...],
                 preferred_element_type=jnp.float32)
    o_ref[...] = jnp.tanh(h3 + b3_ref[...]).astype(o_ref.dtype)


def actor_forward(x, params, *, block_batch=2048):
    """Fused Actor forward pass. Handles any batch size via cdiv grid + masked
    boundary blocks (no wrapper-side padding)."""
    w1, b1, w2, b2, w3, b3 = params
    batch, state_size = x.shape
    fc1_units = w1.shape[1]
    fc2_units = w2.shape[1]
    action_size = w3.shape[1]

    # Batch tile: at most `block_batch`, multiple of 8 (the (8,128) rule on the
    # sublane dim). When more than one 8-row group exists, force >= 2 grid steps
    # so the "parallel" axis can shard across both TensorCores on v7x.
    padded_rows = _round_up(batch, 8)
    tb = _round_up(min(block_batch, padded_rows), 8)
    if padded_rows > 8:
        half = _round_up(pl.cdiv(batch, 2), 8)
        tb = max(min(tb, half), 8)
    grid_steps = pl.cdiv(batch, tb)

    # Weights/biases: constant block index -> DMA'd once, VMEM-resident across
    # all batch tiles. x/out: tiled along the batch axis (double-buffered).
    def resident(a):
        return pl.BlockSpec(a.shape, lambda i: (0,) * a.ndim)

    rows = grid_steps * tb  # rows the kernel actually pushes through the MXU
    flops = 2 * rows * (state_size * fc1_units
                        + fc1_units * fc2_units
                        + fc2_units * action_size)
    bytes_accessed = (batch * state_size * x.dtype.itemsize
                      + sum(p.size * p.dtype.itemsize for p in params)
                      + batch * action_size * 4)

    out = pl.pallas_call(
        actor_kernel,
        out_shape=jax.ShapeDtypeStruct((batch, action_size), jnp.float32),
        grid=(grid_steps,),
        in_specs=[pl.BlockSpec((tb, state_size), lambda i: (i, 0)),
                  resident(w1), resident(b1),
                  resident(w2), resident(b2),
                  resident(w3), resident(b3)],
        out_specs=pl.BlockSpec((tb, action_size), lambda i: (i, 0)),
        compiler_params=pltpu.CompilerParams(
            dimension_semantics=("parallel",),
            # Raise v5e's 16 MiB scoped-VMEM default so tb up to ~2048 fits
            # (~11 MiB of f32/bf16 intermediates); matches v6e/v7x defaults.
            vmem_limit_bytes=32 * 1024 * 1024),
        cost_estimate=pl.CostEstimate(
            flops=flops,
            transcendentals=rows * action_size,   # tanh
            bytes_accessed=bytes_accessed),
    )(x, w1, b1, w2, b2, w3, b3)

    return out


def init_actor_params(key, state_size, action_size, fc1_units=512, fc2_units=256):
    """Init mirroring the given PyTorch module's reset_parameters().

    torch's hidden_init uses weight.size()[0] == out_features for nn.Linear, so
    fc1/fc2 weight range is +/- 1/sqrt(out_features) (exactly as in the spec's
    code); fc3 weight is +/- 0.003. Biases keep PyTorch's default Linear init
    range +/- 1/sqrt(in_features). Weights are stored [in, out] (transposed vs
    torch) and cast to bf16 (documented numerics difference vs f32 torch,
    ~3 significant digits — acceptable for RL); biases stay f32.
    """
    k = jax.random.split(key, 6)

    def u(k_, shape, lim):
        return jax.random.uniform(k_, shape, jnp.float32, -lim, lim)

    w1 = u(k[0], (state_size, fc1_units), 1.0 / np.sqrt(fc1_units)).astype(jnp.bfloat16)
    b1 = u(k[1], (1, fc1_units), 1.0 / np.sqrt(state_size))
    w2 = u(k[2], (fc1_units, fc2_units), 1.0 / np.sqrt(fc2_units)).astype(jnp.bfloat16)
    b2 = u(k[3], (1, fc2_units), 1.0 / np.sqrt(fc1_units))
    w3 = u(k[4], (fc2_units, action_size), 0.003).astype(jnp.bfloat16)
    b3 = u(k[5], (1, action_size), 1.0 / np.sqrt(fc2_units))
    return (w1, b1, w2, b2, w3, b3)


def actor_reference(x, params):
    """Pure-JAX reference using the same bf16-operand / f32-accumulate math."""
    w1, b1, w2, b2, w3, b3 = params
    x = x.astype(w1.dtype)
    h1 = jnp.maximum(jnp.dot(x, w1, preferred_element_type=jnp.float32) + b1, 0.0)
    h2 = jnp.maximum(jnp.dot(h1.astype(w2.dtype), w2,
                             preferred_element_type=jnp.float32) + b2, 0.0)
    return jnp.tanh(jnp.dot(h2.astype(w3.dtype), w3,
                            preferred_element_type=jnp.float32) + b3)


if __name__ == "__main__":
    key = jax.random.PRNGKey(0)
    k_param, k_x1, k_x2 = jax.random.split(key, 3)

    state_size = 32
    action_size = 4
    params = init_actor_params(k_param, state_size, action_size)

    # Tiny acting-path batch (single partial tile, masked boundary block).
    batch_small = 2
    x_small = jax.random.normal(k_x1, (batch_small, state_size), jnp.float32)
    out_small = jax.block_until_ready(actor_forward(x_small, params))
    ref_small = actor_reference(x_small, params)
    np.testing.assert_allclose(np.asarray(out_small), np.asarray(ref_small),
                               rtol=5e-3, atol=5e-3)
    assert out_small.shape == (batch_small, action_size)

    # Mid-size batch: exercises >=2 grid steps (v7x megacore path) and a
    # partial (masked) last tile without any wrapper-side padding.
    batch_mid = 100
    x_mid = jax.random.normal(k_x2, (batch_mid, state_size), jnp.float32)
    out_mid = jax.block_until_ready(actor_forward(x_mid, params))
    ref_mid = actor_reference(x_mid, params)
    np.testing.assert_allclose(np.asarray(out_mid), np.asarray(ref_mid),
                               rtol=5e-3, atol=5e-3)
    assert out_mid.shape == (batch_mid, action_size)

    print("KERNEL_OK")
</pallas_src>

<mosaic_0001>
module attributes {stable_mosaic.version = 11 : i64} {
  func.func @actor_kernel(%arg0: i32, %arg1: memref<8x32xf32, #tpu.memory_space<vmem>>, %arg2: memref<32x512xbf16, #tpu.memory_space<vmem>>, %arg3: memref<1x512xf32, #tpu.memory_space<vmem>>, %arg4: memref<512x256xbf16, #tpu.memory_space<vmem>>, %arg5: memref<1x256xf32, #tpu.memory_space<vmem>>, %arg6: memref<256x4xbf16, #tpu.memory_space<vmem>>, %arg7: memref<1x4xf32, #tpu.memory_space<vmem>>, %arg8: memref<8x4xf32, #tpu.memory_space<vmem>>) attributes {dimension_semantics = [#tpu.dimension_semantics<parallel>], iteration_bounds = array<i64: 1>, scalar_prefetch = 0 : i64, scratch_operands = 0 : i64, tpu.core_type = #tpu.core_type<tc>, window_params = [{transform_indices = @transform_0, window_bounds = array<i64: 8, 32>}, {pipeline_mode = #tpu.pipeline_mode<synchronous>, transform_indices = @transform_1, window_bounds = array<i64: 32, 512>}, {pipeline_mode = #tpu.pipeline_mode<synchronous>, transform_indices = @transform_2, window_bounds = array<i64: 1, 512>}, {pipeline_mode = #tpu.pipeline_mode<synchronous>, transform_indices = @transform_3, window_bounds = array<i64: 512, 256>}, {pipeline_mode = #tpu.pipeline_mode<synchronous>, transform_indices = @transform_4, window_bounds = array<i64: 1, 256>}, {pipeline_mode = #tpu.pipeline_mode<synchronous>, transform_indices = @transform_5, window_bounds = array<i64: 256, 4>}, {pipeline_mode = #tpu.pipeline_mode<synchronous>, transform_indices = @transform_6, window_bounds = array<i64: 1, 4>}, {transform_indices = @transform_7, window_bounds = array<i64: 8, 4>}]} {
    %c0 = arith.constant 0 : index
    %c0_0 = arith.constant 0 : index
    %0 = vector.load %arg1[%c0, %c0_0] : memref<8x32xf32, #tpu.memory_space<vmem>>, vector<8x32xf32>
    %1 = arith.truncf %0 : vector<8x32xf32> to vector<8x32xbf16>
    %c0_1 = arith.constant 0 : index
    %c0_2 = arith.constant 0 : index
    %2 = vector.load %arg2[%c0_1, %c0_2] : memref<32x512xbf16, #tpu.memory_space<vmem>>, vector<32x512xbf16>
    %cst = arith.constant dense<0.000000e+00> : vector<8x512xf32>
    %3 = tpu.matmul %1, %2, %cst {dimension_numbers = #tpu.dot_dimension_numbers<[1], [0], [0], [1], [0, 0, 1, 1], [], []>} : vector<8x32xbf16>, vector<32x512xbf16>, vector<8x512xf32> -> vector<8x512xf32>
    %c0_3 = arith.constant 0 : index
    %c0_4 = arith.constant 0 : index
    %4 = vector.load %arg3[%c0_3, %c0_4] : memref<1x512xf32, #tpu.memory_space<vmem>>, vector<1x512xf32>
    %5 = vector.broadcast %4 : vector<1x512xf32> to vector<8x512xf32>
    %6 = arith.addf %3, %5 : vector<8x512xf32>
    %cst_5 = arith.constant 0.000000e+00 : f32
    %7 = vector.broadcast %cst_5 : f32 to vector<8x512xf32>
    %8 = arith.maximumf %6, %7 : vector<8x512xf32>
    %9 = arith.truncf %8 : vector<8x512xf32> to vector<8x512xbf16>
    %c0_6 = arith.constant 0 : index
    %c0_7 = arith.constant 0 : index
    %10 = vector.load %arg4[%c0_6, %c0_7] : memref<512x256xbf16, #tpu.memory_space<vmem>>, vector<512x256xbf16>
    %cst_8 = arith.constant dense<0.000000e+00> : vector<8x256xf32>
    %11 = tpu.matmul %9, %10, %cst_8 {dimension_numbers = #tpu.dot_dimension_numbers<[1], [0], [0], [1], [0, 0, 1, 1], [], []>} : vector<8x512xbf16>, vector<512x256xbf16>, vector<8x256xf32> -> vector<8x256xf32>
    %c0_9 = arith.constant 0 : index
    %c0_10 = arith.constant 0 : index
    %12 = vector.load %arg5[%c0_9, %c0_10] : memref<1x256xf32, #tpu.memory_space<vmem>>, vector<1x256xf32>
    %13 = vector.broadcast %12 : vector<1x256xf32> to vector<8x256xf32>
    %14 = arith.addf %11, %13 : vector<8x256xf32>
    %cst_11 = arith.constant 0.000000e+00 : f32
    %15 = vector.broadcast %cst_11 : f32 to vector<8x256xf32>
    %16 = arith.maximumf %14, %15 : vector<8x256xf32>
    %17 = arith.truncf %16 : vector<8x256xf32> to vector<8x256xbf16>
    %c0_12 = arith.constant 0 : index
    %c0_13 = arith.constant 0 : index
    %18 = vector.load %arg6[%c0_12, %c0_13] : memref<256x4xbf16, #tpu.memory_space<vmem>>, vector<256x4xbf16>
    %cst_14 = arith.constant dense<0.000000e+00> : vector<8x4xf32>
    %19 = tpu.matmul %17, %18, %cst_14 {dimension_numbers = #tpu.dot_dimension_numbers<[1], [0], [0], [1], [0, 0, 1, 1], [], []>} : vector<8x256xbf16>, vector<256x4xbf16>, vector<8x4xf32> -> vector<8x4xf32>
    %c0_15 = arith.constant 0 : index
    %c0_16 = arith.constant 0 : index
    %20 = vector.load %arg7[%c0_15, %c0_16] : memref<1x4xf32, #tpu.memory_space<vmem>>, vector<1x4xf32>
    %21 = vector.broadcast %20 : vector<1x4xf32> to vector<8x4xf32>
    %22 = arith.addf %19, %21 : vector<8x4xf32>
    %23 = math.tanh %22 : vector<8x4xf32>
    %c0_17 = arith.constant 0 : index
    %c0_18 = arith.constant 0 : index
    %24 = vector.load %arg8[%c0_17, %c0_18] : memref<8x4xf32, #tpu.memory_space<vmem>>, vector<8x4xf32>
    tpu.vector_store %arg8[%c0_17, %c0_18], %23 {strides = array<i32>} : memref<8x4xf32, #tpu.memory_space<vmem>>, vector<8x4xf32>,
    return
  }
  func.func @transform_0(%arg0: i32) -> (i32, i32) {
    %c0_i32 = arith.constant 0 : i32
    %c0_i32_0 = arith.constant 0 : i32
    return %arg0, %c0_i32 : i32, i32
  }
  func.func @transform_1(%arg0: i32) -> (i32, i32) {
    %c0_i32 = arith.constant 0 : i32
    %c0_i32_0 = arith.constant 0 : i32
    %c0_i32_1 = arith.constant 0 : i32
    return %c0_i32, %c0_i32_0 : i32, i32
  }
  func.func @transform_2(%arg0: i32) -> (i32, i32) {
    %c0_i32 = arith.constant 0 : i32
    %c0_i32_0 = arith.constant 0 : i32
    %c0_i32_1 = arith.constant 0 : i32
    return %c0_i32, %c0_i32_0 : i32, i32
  }
  func.func @transform_3(%arg0: i32) -> (i32, i32) {
    %c0_i32 = arith.constant 0 : i32
    %c0_i32_0 = arith.constant 0 : i32
    %c0_i32_1 = arith.constant 0 : i32
    return %c0_i32, %c0_i32_0 : i32, i32
  }
  func.func @transform_4(%arg0: i32) -> (i32, i32) {
    %c0_i32 = arith.constant 0 : i32
    %c0_i32_0 = arith.constant 0 : i32
    %c0_i32_1 = arith.constant 0 : i32
    return %c0_i32, %c0_i32_0 : i32, i32
  }
  func.func @transform_5(%arg0: i32) -> (i32, i32) {
    %c0_i32 = arith.constant 0 : i32
    %c0_i32_0 = arith.constant 0 : i32
    %c0_i32_1 = arith.constant 0 : i32
    return %c0_i32, %c0_i32_0 : i32, i32
  }
  func.func @transform_6(%arg0: i32) -> (i32, i32) {
    %c0_i32 = arith.constant 0 : i32
    %c0_i32_0 = arith.constant 0 : i32
    %c0_i32_1 = arith.constant 0 : i32
    return %c0_i32, %c0_i32_0 : i32, i32
  }
  func.func @transform_7(%arg0: i32) -> (i32, i32) {
    %c0_i32 = arith.constant 0 : i32
    %c0_i32_0 = arith.constant 0 : i32
    return %arg0, %c0_i32 : i32, i32
  }
}

</mosaic_0001>

<bundles_post_ra>
// kernel: tpu_custom_call.1
= control target key start
LH: loop header
LB: loop body
LE: loop exit
PB: predicated region body
PF: predicated region fallthrough
CT: control target
= control target key end

     0   :  { %12 = vsyncpa [#allocation3], 0  ;;  %s1354_s0 = inlined_call_operand.vmem [shape: f32[2,32], index: 0, kind: input, shape index: {}]   ;;  %s1355_s1 = inlined_call_operand.vmem [shape: bf16[32,512], index: 1, kind: input, shape index: {}]   ;;  %s1356_s2 = inlined_call_operand.vmem [shape: f32[1,512], index: 2, kind: input, shape index: {}]   ;;  %s1357_s3 = inlined_call_operand.hbm [shape: bf16[512,256], index: 3, kind: input, shape index: {}]   ;;  %s1358_s4 = inlined_call_operand.vmem [shape: f32[1,256], index: 4, kind: input, shape index: {}]   ;;  %s1359_s5 = inlined_call_operand.vmem [shape: bf16[256,4], index: 5, kind: input, shape index: {}]   ;;  %s1360_s6 = inlined_call_operand.vmem [shape: f32[1,4], index: 6, kind: input, shape index: {}]   ;;  %s1361_s7 = inlined_call_operand.hbm [shape: f32[2,4], index: 7, kind: output, shape index: {}]  }
   0x1   :  { %13 = vsyncpa [#allocation4], 0  ;;  %s1183_s24 = smov [#allocation2]   ;;  %s1135_s28 = scalar_lea.hbm %s1357_s3, 8192 }
   0x2   :  { %s25_s25 = sshll.u32 %s1183_s24, 4  ;;  %p1136_p0 = scmp.ne.s32.totalorder %s1357_s3, %s1135_s28  ;;  %s26_s25 = int_to_ptr.vmem [resolvable:$true] %s25_s25 }
   0x3   :  { %p1139_p1 = scmp.lt.u32.totalorder %s1135_s28, %s1357_s3 }
   0x5   :  { %p1141_p2 = pnand %p1139_p1, %p1136_p0 }
   0x7   :  { %1144 = shalt.err (!%p1141_p2)
}
   0x8   :  { %s1145_s10 = scalar_lea.vmem %s26_s25, 8192  ;;  %p1150_p4 = scmp.lt.s32.totalorder %s26_s25, %s26_s25 }
   0x9   :  { %p1146_p3 = scmp.ne.s32.totalorder %s26_s25, %s1145_s10  ;;  %p1151_p5 = scmp.lt.s32.totalorder %s1145_s10, %s1145_s10 }
   0xb   :  { %p1152_p6 = por %p1151_p5, %p1150_p4 }
   0xd   :  { %p1153_p7 = pnand %p1152_p6, %p1146_p3 }
   0xf   :  { %1156 = shalt.err (!%p1153_p7)
}
  0x10   :  { %s1184_s11 = smov 128   ;;  %s1185_s12 = smov 8  }
  0x11   :  { %31 = dma.hbm_to_vmem [thread:$0]  %s1357_s3, 8192, %s26_s25, [#allocation3], %s1184_s11, %s1184_s11, %s1185_s12  }
  0x12   :  { %1179 = dma.done.wait [#allocation3], 8192  }
  0x13   :  { %1180 = vsyncadd [#allocation3], 4294959104  ;;  %v1186_v0 = vmov 0   ;;  %v1009_v1 = vld [vmem:[%s1355_s1 + $0x4] ss:$16 sps:$4 sm:$0xff]   ;;  %vm114_vm0 = vcmask 261120  }
  0x14   :  { %150 = vmatprep.mubr.bf16.mxu0 %v1186_v0  ;;  %v1011_v2 = vld [vmem:[%s1355_s1] ss:$16 sps:$4 sm:$0xff]   ;;  %118 = vmatprep.subr.bf16.mxu0 %v1009_v1  ;;  %v1012_v3 = vld [vmem:[%s1355_s1 + $0x24] ss:$16 sps:$4 sm:$0xff]   ;;  %v1017_v6 = vld [vmem:[%s1355_s1 + $0xc] ss:$16 sps:$4 sm:$0xff]  }
  0x15   :  { %v1014_v4 = vld [vmem:[%s1355_s1 + $0x20] ss:$16 sps:$4 sm:$0xff]   ;;  %119 = vmatpush1.bf16.msra.mxu0 %v1011_v2  ;;  %v1015_v7 = vld [vmem:[%s1355_s1 + $0x8] ss:$16 sps:$4 sm:$0xff]   ;;  %v1021_v9 = vld [vmem:[#allocation2 + $0x4] ss:$8 sps:$4 sm:$0xff]  }
  0x16   :  { %v42_v5 = vld [vmem:[%s1354_s0] sm:$0xff]  ;;  %120 = vmatprep.subr.bf16.mxu0 %v1012_v3  ;;  %v1024_v11 = vld [vmem:[#allocation2 + $0x14] ss:$8 sps:$4 sm:$0xff]   ;;  %604 = vmatprep.subr.bf16.mxu1 %v1021_v9  ;;  %v1026_v13 = vld [vmem:[#allocation2 + $0x10] ss:$8 sps:$4 sm:$0xff]   ;;  %vm866_vm1 = vcmask 31744  }
  0x17   :  { %v43_v8 = vpack.c.bf16 %v42_v5, %v42_v5  ;;  %v1023_v10 = vld [vmem:[#allocation2] ss:$8 sps:$4 sm:$0xff]   ;;  %v1020_v12 = vld [vmem:[%s1355_s1 + $0x2c] ss:$16 sps:$4 sm:$0xff]   ;;  %v1038_v21 = vld [vmem:[#allocation2 + $0x30] ss:$8 sps:$4 sm:$0xff]  }
  0x18   :  { %605 = vmatpush1.bf16.msra.mxu1 %v1023_v10  ;;  %v1027_v14 = vld [vmem:[#allocation2 + $0x24] ss:$8 sps:$4 sm:$0xff]   ;;  %v1018_v15 = vld [vmem:[%s1355_s1 + $0x28] ss:$16 sps:$4 sm:$0xff]   ;;  %v1033_v18 = vld [vmem:[#allocation2 + $0x34] ss:$8 sps:$4 sm:$0xff]  }
  0x19   :  { %121 = vmatpush1.bf16.msra.mxu0 %v1014_v4  ;;  %606 = vmatprep.subr.bf16.mxu1 %v1024_v11  ;;  %v1031_v16 = vld [vmem:[#allocation2 + $0x104] ss:$8 sps:$4 sm:$0xff]   ;;  %v1032_v17 = vld [vmem:[#allocation2 + $0x20] ss:$8 sps:$4 sm:$0xff]   ;;  %v1037_v20 = vld [vmem:[#allocation2 + $0x114] ss:$8 sps:$4 sm:$0xff]  }
  0x1a   :  { %159 = vmatprep.subr.bf16.mxu0 %v1017_v6  ;;  %v1029_v19 = vld [vmem:[#allocation2 + $0x100] ss:$8 sps:$4 sm:$0xff]   ;;  %v1039_v22 = vld [vmem:[#allocation2 + $0x44] ss:$8 sps:$4 sm:$0xff]   ;;  %v1035_v23 = vld [vmem:[#allocation2 + $0x110] ss:$8 sps:$4 sm:$0xff]  }
  0x1b   :  { %v1043_v24 = vld [vmem:[#allocation2 + $0x124] ss:$8 sps:$4 sm:$0xff]   ;;  %v1044_v25 = vld [vmem:[#allocation2 + $0x40] ss:$8 sps:$4 sm:$0xff]   ;;  %v1045_v26 = vld [vmem:[#allocation2 + $0x54] ss:$8 sps:$4 sm:$0xff]  }
  0x1c   :  { %893 = vmatmul.mubr.msk.bf16.vlgmr.msra.gmra.mrb[0].mxu0 %vm114_vm0, %v43_v8  ;;  %607 = vmatpush1.bf16.msra.mxu1 %v1026_v13  ;;  %v1041_v27 = vld [vmem:[#allocation2 + $0x120] ss:$8 sps:$4 sm:$0xff]   ;;  %v1049_v28 = vld [vmem:[#allocation2 + $0x134] ss:$8 sps:$4 sm:$0xff]   ;;  %v1050_v29 = vld [vmem:[#allocation2 + $0x50] ss:$8 sps:$4 sm:$0xff]  }
  0x1d   :  { %160 = vmatpush1.bf16.msra.mxu0 %v1015_v7  ;;  %191 = vmatprep.mubr.bf16.mxu0 %v1186_v0  ;;  %v1051_v30 = vld [vmem:[#allocation2 + $0x64] ss:$8 sps:$4 sm:$0xff]   ;;  %v1047_v31 = vld [vmem:[#allocation2 + $0x130] ss:$8 sps:$4 sm:$0xff]   ;;  %v1056_v33 = vld [vmem:[#allocation2 + $0x60] ss:$8 sps:$4 sm:$0xff]  }
  0x1e   :  { %161 = vmatprep.subr.bf16.mxu0 %v1020_v12  ;;  %608 = vmatprep.subr.bf16.mxu1 %v1027_v14  ;;  %v1055_v32 = vld [vmem:[#allocation2 + $0x144] ss:$8 sps:$4 sm:$0xff]   ;;  %v1057_v34 = vld [vmem:[#allocation2 + $0x74] ss:$8 sps:$4 sm:$0xff]   ;;  %v1053_v35 = vld [vmem:[#allocation2 + $0x140] ss:$8 sps:$4 sm:$0xff]   ;;  %v54_v12 = vlaneseq }
  0x1f   :  { %v1061_v36 = vld [vmem:[#allocation2 + $0x154] ss:$8 sps:$4 sm:$0xff]   ;;  %v1062_v37 = vld [vmem:[#allocation2 + $0x70] ss:$8 sps:$4 sm:$0xff]   ;;  %v1063_v38 = vld [vmem:[#allocation2 + $0x84] ss:$8 sps:$4 sm:$0xff]  }
  0x20   :  { %609 = vmatpush1.bf16.msra.mxu1 %v1032_v17  ;;  %v1059_v39 = vld [vmem:[#allocation2 + $0x150] ss:$8 sps:$4 sm:$0xff]   ;;  %v1067_v40 = vld [vmem:[#allocation2 + $0x164] ss:$8 sps:$4 sm:$0xff]   ;;  %v1068_v41 = vld [vmem:[#allocation2 + $0x80] ss:$8 sps:$4 sm:$0xff]  }
  0x21   :  { %162 = vmatpush1.bf16.msra.mxu0 %v1018_v15  ;;  %610 = vmatprep.subr.bf16.mxu1 %v1033_v18  ;;  %v1069_v42 = vld [vmem:[#allocation2 + $0x94] ss:$8 sps:$4 sm:$0xff]   ;;  %v1065_v43 = vld [vmem:[#allocation2 + $0x160] ss:$8 sps:$4 sm:$0xff]   ;;  %v1074_v45 = vld [vmem:[#allocation2 + $0x90] ss:$8 sps:$4 sm:$0xff]  }
  0x22   :  { %645 = vmatprep.subr.bf16.mxu0 %v1031_v16  ;;  %v1073_v44 = vld [vmem:[#allocation2 + $0x174] ss:$8 sps:$4 sm:$0xff]   ;;  %v1075_v46 = vld [vmem:[#allocation2 + $0xa4] ss:$8 sps:$4 sm:$0xff]   ;;  %v1071_v47 = vld [vmem:[#allocation2 + $0x170] ss:$8 sps:$4 sm:$0xff]  }
  0x23   :  { %v1079_v48 = vld [vmem:[#allocation2 + $0x184] ss:$8 sps:$4 sm:$0xff]   ;;  %v1080_v49 = vld [vmem:[#allocation2 + $0xa0] ss:$8 sps:$4 sm:$0xff]   ;;  %v1081_v50 = vld [vmem:[#allocation2 + $0xb4] ss:$8 sps:$4 sm:$0xff]  }
  0x24   :  { %894 = vmatmul.mubr.msk.bf16.vlgmr.msra.gmra.mrb[4].mxu0 %vm114_vm0, %v43_v8  ;;  %611 = vmatpush1.bf16.msra.mxu1 %v1038_v21  ;;  %v1077_v51 = vld [vmem:[#allocation2 + $0x180] ss:$8 sps:$4 sm:$0xff]   ;;  %v1085_v52 = vld [vmem:[#allocation2 + $0x194] ss:$8 sps:$4 sm:$0xff]   ;;  %v1086_v53 = vld [vmem:[#allocation2 + $0xb0] ss:$8 sps:$4 sm:$0xff]  }
  0x25   :  { %646 = vmatpush1.bf16.msra.mxu0 %v1029_v19  ;;  %612 = vmatprep.subr.bf16.mxu1 %v1039_v22  ;;  %v1087_v54 = vld [vmem:[#allocation2 + $0xc4] ss:$8 sps:$4 sm:$0xff]   ;;  %v1083_v55 = vld [vmem:[#allocation2 + $0x190] ss:$8 sps:$4 sm:$0xff]   ;;  %v1092_v57 = vld [vmem:[#allocation2 + $0xc0] ss:$8 sps:$4 sm:$0xff]  }
  0x26   :  { %647 = vmatprep.subr.bf16.mxu0 %v1037_v20  ;;  %v1091_v56 = vld [vmem:[#allocation2 + $0x1a4] ss:$8 sps:$4 sm:$0xff]   ;;  %v1093_v58 = vld [vmem:[#allocation2 + $0xd4] ss:$8 sps:$4 sm:$0xff]   ;;  %v1089_v59 = vld [vmem:[#allocation2 + $0x1a0] ss:$8 sps:$4 sm:$0xff]  }
  0x27   :  { %v1097_v60 = vld [vmem:[#allocation2 + $0x1b4] ss:$8 sps:$4 sm:$0xff]   ;;  %v1098_v61 = vld [vmem:[#allocation2 + $0xd0] ss:$8 sps:$4 sm:$0xff]   ;;  %v1099_v63 = vld [vmem:[#allocation2 + $0xe4] ss:$8 sps:$4 sm:$0xff]  }
  0x28   :  { %613 = vmatpush1.bf16.msra.mxu1 %v1044_v25  ;;  %v1095_v62 = vld [vmem:[#allocation2 + $0x1b0] ss:$8 sps:$4 sm:$0xff]   ;;  %v1103_v0 = vld [vmem:[#allocation2 + $0x1c4] ss:$8 sps:$4 sm:$0xff]   ;;  %v1101_v1 = vld [vmem:[#allocation2 + $0x1c0] ss:$8 sps:$4 sm:$0xff]  }
  0x29   :  { %648 = vmatpush1.bf16.msra.mxu0 %v1035_v23  ;;  %614 = vmatprep.subr.bf16.mxu1 %v1045_v26  ;;  %v1104_v2 = vld [vmem:[#allocation2 + $0xe0] ss:$8 sps:$4 sm:$0xff]   ;;  %v1105_v3 = vld [vmem:[#allocation2 + $0xf4] ss:$8 sps:$4 sm:$0xff]   ;;  %v1107_v5 = vld [vmem:[#allocation2 + $0x1d0] ss:$8 sps:$4 sm:$0xff]  }
  0x2a   :  { %649 = vmatprep.subr.bf16.mxu0 %v1043_v24  ;;  %v1109_v4 = vld [vmem:[#allocation2 + $0x1d4] ss:$8 sps:$4 sm:$0xff]   ;;  %v1110_v6 = vld [vmem:[#allocation2 + $0xf0] ss:$8 sps:$4 sm:$0xff]   ;;  %v1113_v7 = vld [vmem:[#allocation2 + $0x1e4] ss:$8 sps:$4 sm:$0xff]  }
  0x2b   :  { %v1111_v8 = vld [vmem:[#allocation2 + $0x1e0] ss:$8 sps:$4 sm:$0xff]   ;;  %v1116_v9 = vld [vmem:[#allocation2 + $0x1f4] ss:$8 sps:$4 sm:$0xff]   ;;  %v1114_v10 = vld [vmem:[#allocation2 + $0x1f0] ss:$8 sps:$4 sm:$0xff]  }
  0x2c   :  { %615 = vmatpush1.bf16.msra.mxu1 %v1050_v29  ;;  %v1117_v11 = vld [vmem:[%s1359_s5 + $0x40] sm:$0xff]   ;;  %v1274_v13 = vshrl.u32 %v54_v12, 7 }
  0x2d   :  { %650 = vmatpush1.bf16.msra.mxu0 %v1041_v27  ;;  %616 = vmatprep.subr.bf16.mxu1 %v1051_v30  ;;  %v52_v15 = vld [vmem:[%s1356_s2] sm:$0xf] }
  0x2e   :  { %651 = vmatprep.subr.bf16.mxu0 %v1049_v28  ;;  %v56_v14 = vsub.s32 0, %v1274_v13  ;;  %v60_v16 = vsub.s32 1, %v1274_v13  ;;  %v64_v22 = vsub.s32 2, %v1274_v13  ;;  %v68_v25 = vsub.s32 3, %v1274_v13  ;;  %v959_v13 = vld [vmem:[%s1360_s6] ss:$0 sm:$0xff] }
  0x30   :  { %617 = vmatpush1.bf16.msra.mxu1 %v1056_v33  ;;  %v57_v17 = vrot.slane %v52_v15, %v56_v14  ;;  %v61_v18 = vrot.slane %v52_v15, %v60_v16  ;;  %v65_v29 = vrot.slane %v52_v15, %v64_v22 }
  0x31   :  { %652 = vmatpush1.bf16.msra.mxu0 %v1047_v31  ;;  %618 = vmatprep.subr.bf16.mxu1 %v1057_v34  ;;  %v69_v31 = vrot.slane %v52_v15, %v68_v25  ;;  %v1119_v34 = vld [vmem:[%s1359_s5 + $0x48] sm:$0xff]  }
  0x32   :  { %653 = vmatprep.subr.bf16.mxu0 %v1055_v32  ;;  %v1118_v32 = vld [vmem:[%s1359_s5] sm:$0xff]  }
  0x34   :  { %619 = vmatpush1.bf16.msra.mxu1 %v1062_v37 }
  0x35   :  { %654 = vmatpush1.bf16.msra.mxu0 %v1053_v35  ;;  %620 = vmatprep.subr.bf16.mxu1 %v1063_v38 }
  0x36   :  { %655 = vmatprep.subr.bf16.mxu0 %v1061_v36 }
  0x38   :  { %621 = vmatpush1.bf16.msra.mxu1 %v1068_v41 }
  0x39   :  { %656 = vmatpush1.bf16.msra.mxu0 %v1059_v39  ;;  %622 = vmatprep.subr.bf16.mxu1 %v1069_v42 }
  0x3a   :  { %657 = vmatprep.subr.bf16.mxu0 %v1067_v40  ;;  %v1120_v40 = vld [vmem:[%s1359_s5 + $0x8] sm:$0xff]  }
  0x3c   :  { %623 = vmatpush1.bf16.msra.mxu1 %v1074_v45 }
  0x3d   :  { %658 = vmatpush1.bf16.msra.mxu0 %v1065_v43  ;;  %624 = vmatprep.subr.bf16.mxu1 %v1075_v46  ;;  %v1121_v43 = vld [vmem:[%s1359_s5 + $0x50] sm:$0xff]  }
  0x3e   :  { %659 = vmatprep.subr.bf16.mxu0 %v1073_v44  ;;  %v1122_v46 = vld [vmem:[%s1359_s5 + $0x10] sm:$0xff]  }
  0x40   :  { %625 = vmatpush1.bf16.msra.mxu1 %v1080_v49  ;;  %v1124_v49 = vld [vmem:[%s1359_s5 + $0x18] sm:$0xff]  }
  0x41   :  { %660 = vmatpush1.bf16.msra.mxu0 %v1071_v47  ;;  %626 = vmatprep.subr.bf16.mxu1 %v1081_v50  ;;  %v1125_v50 = vld [vmem:[%s1359_s5 + $0x60] sm:$0xff]  }
  0x42   :  { %661 = vmatprep.subr.bf16.mxu0 %v1079_v48  ;;  %v1123_v48 = vld [vmem:[%s1359_s5 + $0x58] sm:$0xff]  }
  0x44   :  { %627 = vmatpush1.bf16.msra.mxu1 %v1086_v53  ;;  %v1128_v53 = vld [vmem:[%s1359_s5 + $0x28] sm:$0xff]  }
  0x45   :  { %662 = vmatpush1.bf16.msra.mxu0 %v1077_v51  ;;  %628 = vmatprep.subr.bf16.mxu1 %v1087_v54  ;;  %v1126_v51 = vld [vmem:[%s1359_s5 + $0x20] sm:$0xff]   ;;  %v1129_v54 = vld [vmem:[%s1359_s5 + $0x70] sm:$0xff]  }
  0x46   :  { %663 = vmatprep.subr.bf16.mxu0 %v1085_v52  ;;  %v1127_v52 = vld [vmem:[%s1359_s5 + $0x68] sm:$0xff]  }
  0x48   :  { %629 = vmatpush1.bf16.msra.mxu1 %v1092_v57  ;;  %v1132_v57 = vld [vmem:[%s1359_s5 + $0x38] sm:$0xff]  }
  0x49   :  { %664 = vmatpush1.bf16.msra.mxu0 %v1083_v55  ;;  %630 = vmatprep.subr.bf16.mxu1 %v1093_v58  ;;  %v1130_v55 = vld [vmem:[%s1359_s5 + $0x30] sm:$0xff]   ;;  %v272_v58 = vld [vmem:[%s1358_s4] sm:$0x3] }
  0x4a   :  { %665 = vmatprep.subr.bf16.mxu0 %v1091_v56  ;;  %v1131_v56 = vld [vmem:[%s1359_s5 + $0x78] sm:$0xff]  }
  0x4c   :  { %631 = vmatpush1.bf16.msra.mxu1 %v1098_v61 }
  0x4d   :  { %666 = vmatpush1.bf16.msra.mxu0 %v1089_v59  ;;  %632 = vmatprep.subr.bf16.mxu1 %v1099_v63 }
  0x4e   :  { %667 = vmatprep.subr.bf16.mxu0 %v1097_v60 }
  0x50   :  { %633 = vmatpush1.bf16.msra.mxu1 %v1104_v2 }
  0x51   :  { %668 = vmatpush1.bf16.msra.mxu0 %v1095_v62  ;;  %634 = vmatprep.subr.bf16.mxu1 %v1105_v3  ;;  %v277_v62 = vrot.slane %v272_v58, %v56_v14 }
  0x52   :  { %669 = vmatprep.subr.bf16.mxu0 %v1103_v0  ;;  %v281_v0 = vrot.slane %v272_v58, %v60_v16 }
  0x54   :  { %635 = vmatpush1.bf16.msra.mxu1 %v1110_v6 }
  0x55   :  { %670 = vmatpush1.bf16.msra.mxu0 %v1101_v1  ;;  %976 = vmatprep.subr.bf16.mxu1 %v1117_v11 }
  0x56   :  { %671 = vmatprep.subr.bf16.mxu0 %v1109_v4 }
  0x59   :  { %672 = vmatpush1.bf16.msra.mxu0 %v1107_v5 }
  0x5a   :  { %673 = vmatprep.subr.bf16.mxu0 %v1113_v7 }
  0x5d   :  { %674 = vmatpush1.bf16.msra.mxu0 %v1111_v8 }
  0x5e   :  { %675 = vmatprep.subr.bf16.mxu0 %v1116_v9 }
  0x61   :  { %676 = vmatpush1.bf16.msra.mxu0 %v1114_v10 }
  0xef   :  { %v152_v19 = vpop.f32.mrb[0].mxu0 }
  0xf0   :  { %v153_v20 = vadd.f32 %v152_v19, %v57_v17  ;;  %v154_v21 = vpop.f32.mrb[1].mxu0 }
  0xf1   :  { %v155_v23 = vadd.f32 %v154_v21, %v61_v18  ;;  %v156_v24 = vpop.f32.mrb[2].mxu0 }
  0xf2   :  { %v200_v26 = vmax.f32 %v153_v20, 0.0  ;;  %v157_v27 = vpop.f32.mrb[3].mxu0 }
  0xf3   :  { %v201_v28 = vmax.f32 %v155_v23, 0.0 }
  0xf4   :  { %v204_v33 = vpack.c.bf16 %v200_v26, %v200_v26 }
  0xf5   :  { %v205_v30 = vpack.c.bf16 %v201_v28, %v201_v28 }
  0xf7   :  { %v193_v35 = vpop.f32.mrb[4].mxu0  ;;  %636 = vmatprep.mubr.bf16.mxu1 %v205_v30 }
  0xf8   :  { %v194_v36 = vadd.f32 %v193_v35, %v65_v29  ;;  %v195_v37 = vpop.f32.mrb[5].mxu0  ;;  %637 = vmatmul.mubr.bf16.vlgmr.msra.gmra.mrb[0].mxu1 %v204_v33 }
  0xf9   :  { %v196_v38 = vadd.f32 %v195_v37, %v69_v31  ;;  %v197_v39 = vpop.f32.mrb[6].mxu0  ;;  %977 = vmatpush3.bf16.msra.mxu1 %v1118_v32 }
  0xfa   :  { %v202_v41 = vmax.f32 %v194_v36, 0.0  ;;  %v198_v42 = vpop.f32.mrb[7].mxu0  ;;  %978 = vmatprep.subr.bf16.mxu1 %v1119_v34 }
  0xfb   :  { %v203_v44 = vmax.f32 %v196_v38, 0.0 }
  0xfc   :  { %v206_v47 = vpack.c.bf16 %v202_v41, %v202_v41 }
  0xfd   :  { %v207_v45 = vpack.c.bf16 %v203_v44, %v203_v44  ;;  %979 = vmatpush3.bf16.msra.mxu1 %v1120_v40 }
  0xfe   :  { %980 = vmatprep.subr.bf16.mxu1 %v1121_v43 }
  0xff   :  { %677 = vmatprep.mubr.bf16.mxu0 %v207_v45 }
 0x100   :  { %678 = vmatmul.mubr.bf16.vlgmr.msra.gmra.mrb[8].mxu0 %v206_v47 }
 0x101   :  { %981 = vmatpush3.bf16.msra.mxu1 %v1122_v46 }
 0x102   :  { %982 = vmatprep.subr.bf16.mxu1 %v1123_v48 }
 0x105   :  { %983 = vmatpush3.bf16.msra.mxu1 %v1124_v49 }
 0x106   :  { %984 = vmatprep.subr.bf16.mxu1 %v1125_v50 }
 0x109   :  { %985 = vmatpush3.bf16.msra.mxu1 %v1126_v51 }
 0x10a   :  { %986 = vmatprep.subr.bf16.mxu1 %v1127_v52 }
 0x10d   :  { %987 = vmatpush3.bf16.msra.mxu1 %v1128_v53 }
 0x10e   :  { %988 = vmatprep.subr.bf16.mxu1 %v1129_v54 }
 0x111   :  { %989 = vmatpush3.bf16.msra.mxu1 %v1130_v55 }
 0x112   :  { %990 = vmatprep.subr.bf16.mxu1 %v1131_v56 }
 0x115   :  { %991 = vmatpush3.bf16.msra.mxu1 %v1132_v57 }
 0x1cb   :  { %v638_v59 = vpop.f32.mrb[0].mxu1 }
 0x1cc   :  { %v640_v60 = vpop.f32.mrb[1].mxu1  ;;  %v639_v1 = vadd.f32 %v638_v59, %v277_v62 }
 0x1cd   :  { %v642_v61 = vpop.f32.mrb[2].mxu1  ;;  %v641_v2 = vadd.f32 %v640_v60, %v281_v0 }
 0x1ce   :  { %v643_v63 = vpop.f32.mrb[3].mxu1 }
 0x1d3   :  { %v679_v3 = vpop.f32.mrb[8].mxu0 }
 0x1d4   :  { %v680_v4 = vadd.f32 %v679_v3, %v639_v1  ;;  %v681_v5 = vpop.f32.mrb[9].mxu0 }
 0x1d5   :  { %v682_v6 = vadd.f32 %v681_v5, %v641_v2  ;;  %v683_v7 = vpop.f32.mrb[10].mxu0 }
 0x1d6   :  { %v686_v8 = vmax.f32 %v680_v4, 0.0  ;;  %v684_v9 = vpop.f32.mrb[11].mxu0 }
 0x1d7   :  { %v687_v10 = vmax.f32 %v682_v6, 0.0 }
 0x1d8   :  { %v688_v12 = vpack.c.bf16 %v686_v8, %v686_v8 }
 0x1d9   :  { %v689_v11 = vpack.c.bf16 %v687_v10, %v687_v10 }
 0x1db   :  { %857 = vmatprep.mubr.bf16.mxu1 %v689_v11 }
 0x1dc   :  { %858 = vmatmul.mubr.bf16.vlgmr.msra.gmra.mrb[4].mxu1 %v688_v12 }
 0x2af   :  { %v992_v15 = vpop.f32.mrb[4].mxu1 }
 0x2b0   :  { %v993_v14 = vpop.f32.mrb[5].mxu1 }
 0x2b1   :  { %v994_v16 = vadd.f32 %v993_v14, %v992_v15  ;;  %v995_v17 = vpop.f32.mrb[6].mxu1 }
 0x2b2   :  { %v996_v18 = vpop.f32.mrb[7].mxu1 }
 0x2b3   :  { %v860_v19 = vadd.f32 %v994_v16, %v959_v13 }
 0x2b5   :  { %1133 = vtanh.f32 %v860_v19 }
 0x2bf   :  { %v1134_v20 = vpop.eup %1133 }
 0x2c0   :  { %867 = vst.msk [vmem:[#allocation5] sm:$0xff] %vm866_vm1, %v1134_v20 }
 0x2c1   :  { %872 = vsyncadd [#allocation4], 96  ;;  %s1187_s15 = smov [#allocation5]  }
 0x2c2   :  { %s873_s16 = sshll.u32 %s1187_s15, 4  ;;  %s874_s16 = int_to_ptr.vmem [resolvable:$true] %s873_s16 }
 0x2c3   :  { %s1157_s17 = scalar_lea.vmem %s874_s16, 32  ;;  %s1161_s18 = scalar_lea.vmem %s874_s16, 128 }
 0x2c4   :  { %p1158_p8 = scmp.ne.s32.totalorder %s874_s16, %s1157_s17  ;;  %p1162_p9 = scmp.lt.s32.totalorder %s874_s16, %s874_s16 }
 0x2c5   :  { %p1163_p10 = scmp.lt.s32.totalorder %s1161_s18, %s1157_s17 }
 0x2c7   :  { %p1164_p11 = por %p1163_p10, %p1162_p9 }
 0x2c9   :  { %p1165_p12 = pnand %p1164_p11, %p1158_p8 }
 0x2cb   :  { %1168 = shalt.err (!%p1165_p12)
}
 0x2cc   :  { %s1169_s20 = scalar_lea.hbm %s1361_s7, 32 }
 0x2cd   :  { %p1170_p13 = scmp.ne.s32.totalorder %s1361_s7, %s1169_s20  ;;  %p1173_p0 = scmp.lt.u32.totalorder %s1169_s20, %s1361_s7 }
 0x2cf   :  { %p1175_p1 = pnand %p1173_p0, %p1170_p13 }
 0x2d1   :  { %1178 = shalt.err (!%p1175_p1)
}
 0x2d2   :  { %s1188_s24 = smov 32   ;;  %s1189_s25 = smov 2  }
 0x2d3   :  { %879 = dma.vmem_to_hbm [thread:$0]  %s874_s16, 32, %s1361_s7, [#allocation4], %s1188_s24, %s1188_s24, %s1189_s25  }
 0x2d4   :  { %1181 = dma.done.wait [#allocation4], 128  }
 0x2d5   :  { %1182 = vsyncadd [#allocation4], 4294967168 }
 0x2d6   :  { %883 = vsyncpa [#allocation3], 1 }
 0x2d7   :  { %884 = vsyncpa [#allocation4], 1 }

</bundles_post_ra>
